<compile_context>
chip_gen: v7x
topology: tpu7x:2x2x1
jax: 0.10.0
libtpu: 0.0.40
codegen_flags: <defaults>
</compile_context>

<pallas_src>
import jax
import jax.numpy as jnp
from jax.experimental import pallas as pl
from jax.experimental.pallas import tpu as pltpu


def _round_up(n, m):
    return ((n + m - 1) // m) * m


def mlp_kernel(x_ref, w1_ref, b1_ref, w2t_ref, b2t_ref,
               w3t_ref, b3t_ref, w4t_ref, b4t_ref, o_ref):
    """Fused 4-layer MLP (Linear->ReLU x3 -> Linear) on one batch tile.

    All weights/biases (<5 KiB total) stay VMEM-resident across grid steps
    (constant index_maps -> no per-step re-DMA).  Layer 1 runs batch-major,
    then the activation is flipped once to feature-major (XLU transpose,
    otherwise-idle slot) so layers 2-4 stream <=24 LHS rows through the MXU
    instead of tile_b rows, activations are lane-dense (no >80%-wasted vreg
    lanes in ReLU/bias), and the final (1, tile_b) row is stored lane-dense
    with no trailing transpose.  Dots accumulate in f32; operands may be bf16
    (1 MXU pass instead of ~3, and half the HBM bytes for x).
    """
    # Layer 1: (tile_b, F) @ (F, 24) -> (tile_b, 24), f32 accumulation.
    h = jnp.dot(x_ref[...], w1_ref[...],
                preferred_element_type=jnp.float32) + b1_ref[...]
    h = jnp.maximum(h, 0.0)                                     # ReLU

    # Flip to feature-major once: (tile_b, 24) -> (24, tile_b).
    ht = h.T

    # Layers 2-4: (out, in) @ (in, tile_b); biases are (out, 1) columns.
    ht = jnp.dot(w2t_ref[...], ht.astype(w2t_ref.dtype),
                 preferred_element_type=jnp.float32) + b2t_ref[...]
    ht = jnp.maximum(ht, 0.0)                                   # (12, tile_b)
    ht = jnp.dot(w3t_ref[...], ht.astype(w3t_ref.dtype),
                 preferred_element_type=jnp.float32) + b3t_ref[...]
    ht = jnp.maximum(ht, 0.0)                                   # (6, tile_b)
    ht = jnp.dot(w4t_ref[...], ht.astype(w4t_ref.dtype),
                 preferred_element_type=jnp.float32) + b4t_ref[...]  # (1, tile_b)

    # Lane-dense store (tile_b is a multiple of 128 -> unmasked vst).
    o_ref[...] = ht.astype(o_ref.dtype)


def regression_model_forward(x, params, *, tile_b=8192, use_bf16=True):
    """x: (B, in_features) f32. params: dict of (in,out) weights and (1,out) biases."""
    B, F = x.shape
    w1, b1 = params["w1"], params["b1"]
    # Layers 2-4 in PyTorch-native (out, in) layout; biases as (out, 1) columns.
    w2t, b2t = params["w2"].T, params["b2"].reshape(-1, 1)
    w3t, b3t = params["w3"].T, params["b3"].reshape(-1, 1)
    w4t, b4t = params["w4"].T, params["b4"].reshape(-1, 1)

    if use_bf16:
        # bf16 operands: ~3x fewer MXU passes than f32xf32 and half the HBM
        # bytes for the dominant x stream.  Dots still accumulate in f32 and
        # biases are added in f32; validated at ~5e-2 tolerance below.
        x = x.astype(jnp.bfloat16)
        w1, w2t, w3t, w4t = (w.astype(jnp.bfloat16) for w in (w1, w2t, w3t, w4t))

    # tile_b must be a multiple of 128 for the lane-dense (1, tile_b) output
    # row (unmasked vst); large tiles amortize the ~0.35 us per-grid-step
    # overhead.  An 8192 x 32 bf16 tile is ~0.5 MiB (1 MiB double-buffered) —
    # trivially within every generation's VMEM, including v7x's 64 MiB.
    tile_b = max(128, (int(tile_b) // 128) * 128)
    tile_b = min(tile_b, _round_up(B, 128))
    if B > 128:
        # Keep >= 2 grid steps so the 'parallel' batch axis can actually split
        # across v7x's two TensorCores (no effect on single-TC v5e/v6e).
        tile_b = min(tile_b, _round_up(pl.cdiv(B, 2), 128))
    num_tiles = pl.cdiv(B, tile_b)
    padded_b = num_tiles * tile_b

    def param_spec(arr):
        # Whole parameter resident in VMEM every step; constant index_map.
        return pl.BlockSpec(arr.shape, lambda i: (0, 0))

    flops = 2 * padded_b * (F * 24 + 24 * 12 + 12 * 6 + 6 * 1)
    param_bytes = sum(int(a.size) * a.dtype.itemsize
                      for a in (w1, b1, w2t, b2t, w3t, b3t, w4t, b4t))
    bytes_accessed = padded_b * (F * x.dtype.itemsize + 4) + param_bytes

    out_row = pl.pallas_call(
        mlp_kernel,
        out_shape=jax.ShapeDtypeStruct((1, padded_b), jnp.float32),
        grid_spec=pltpu.PrefetchScalarGridSpec(
            num_scalar_prefetch=0,
            grid=(num_tiles,),
            in_specs=[
                pl.BlockSpec((tile_b, F), lambda i: (i, 0)),   # x tile over batch
                param_spec(w1), param_spec(b1),
                param_spec(w2t), param_spec(b2t),
                param_spec(w3t), param_spec(b3t),
                param_spec(w4t), param_spec(b4t),
            ],
            # One lane-dense (1, tile_b) output row per grid step.
            out_specs=pl.BlockSpec((1, tile_b), lambda i: (0, i)),
        ),
        compiler_params=pltpu.CompilerParams(
            # Batch tiles are independent -> megacore-shardable on v7x.
            dimension_semantics=("parallel",),
        ),
        cost_estimate=pl.CostEstimate(
            flops=int(flops),
            transcendentals=0,
            bytes_accessed=int(bytes_accessed)),
    )(x, w1, b1, w2t, b2t, w3t, b3t, w4t, b4t)

    # (1, padded_b) lane-dense row -> (B, 1) column, dropping batch padding.
    # TODO(synk): rows past B in the last tile are computed from padded data
    # and discarded here; add in-kernel masking if a batch-wise reduction is
    # ever added.
    return out_row[0, :B][:, None]


def init_params(key, in_features):
    """Deterministic init mirroring PyTorch Linear default: U(-1/sqrt(fan_in), 1/sqrt(fan_in))."""
    dims = [(in_features, 24), (24, 12), (12, 6), (6, 1)]
    params = {}
    for idx, (fan_in, fan_out) in enumerate(dims, start=1):
        key, kw, kb = jax.random.split(key, 3)
        bound = 1.0 / jnp.sqrt(jnp.asarray(fan_in, jnp.float32))
        params[f"w{idx}"] = jax.random.uniform(
            kw, (fan_in, fan_out), jnp.float32, -bound, bound)
        params[f"b{idx}"] = jax.random.uniform(
            kb, (1, fan_out), jnp.float32, -bound, bound)
    return params


def reference_forward(x, params):
    h = jnp.maximum(x @ params["w1"] + params["b1"], 0.0)
    h = jnp.maximum(h @ params["w2"] + params["b2"], 0.0)
    h = jnp.maximum(h @ params["w3"] + params["b3"], 0.0)
    return h @ params["w4"] + params["b4"]


if __name__ == "__main__":
    key = jax.random.PRNGKey(0)
    in_features = 32
    batch = 8

    key, kx = jax.random.split(key)
    x = jax.random.normal(kx, (batch, in_features), jnp.float32)
    params = init_params(key, in_features)
    ref = reference_forward(x, params)

    # Exact f32 path: must match the pure-JAX reference tightly.
    out_f32 = jax.block_until_ready(
        regression_model_forward(x, params, use_bf16=False))
    assert out_f32.shape == (batch, 1), out_f32.shape
    assert jnp.allclose(out_f32, ref, atol=1e-5, rtol=1e-5), "f32 path mismatch"

    # Default bf16 path: bf16 operands, f32 accumulation -> looser tolerance.
    out_bf16 = jax.block_until_ready(regression_model_forward(x, params))
    assert out_bf16.shape == (batch, 1), out_bf16.shape
    assert jnp.allclose(out_bf16, ref, atol=5e-2, rtol=5e-2), "bf16 path mismatch"

    # Multi-tile / partial-last-tile paths.
    key, kx2 = jax.random.split(key)
    x2 = jax.random.normal(kx2, (300, in_features), jnp.float32)
    ref2 = reference_forward(x2, params)

    out2 = jax.block_until_ready(
        regression_model_forward(x2, params, tile_b=128, use_bf16=False))
    assert out2.shape == (300, 1), out2.shape
    assert jnp.allclose(out2, ref2, atol=1e-5, rtol=1e-5), "tiled f32 mismatch"

    out2b = jax.block_until_ready(
        regression_model_forward(x2, params, tile_b=256))
    assert out2b.shape == (300, 1), out2b.shape
    assert jnp.allclose(out2b, ref2, atol=5e-2, rtol=5e-2), "tiled bf16 mismatch"

    print("KERNEL_OK")
</pallas_src>

<mosaic_0001>
module attributes {stable_mosaic.version = 11 : i64} {
  func.func @mlp_kernel(%arg0: i32, %arg1: memref<128x32xf32, #tpu.memory_space<vmem>>, %arg2: memref<32x24xf32, #tpu.memory_space<vmem>>, %arg3: memref<1x24xf32, #tpu.memory_space<vmem>>, %arg4: memref<12x24xf32, #tpu.memory_space<vmem>>, %arg5: memref<12x1xf32, #tpu.memory_space<vmem>>, %arg6: memref<6x12xf32, #tpu.memory_space<vmem>>, %arg7: memref<6x1xf32, #tpu.memory_space<vmem>>, %arg8: memref<1x6xf32, #tpu.memory_space<vmem>>, %arg9: memref<1x1xf32, #tpu.memory_space<vmem>>, %arg10: memref<1x128xf32, #tpu.memory_space<vmem>>) attributes {dimension_semantics = [#tpu.dimension_semantics<parallel>], iteration_bounds = array<i64: 1>, scalar_prefetch = 0 : i64, scratch_operands = 0 : i64, tpu.core_type = #tpu.core_type<tc>, window_params = [{transform_indices = @transform_0, window_bounds = array<i64: 128, 32>}, {pipeline_mode = #tpu.pipeline_mode<synchronous>, transform_indices = @transform_1, window_bounds = array<i64: 32, 24>}, {pipeline_mode = #tpu.pipeline_mode<synchronous>, transform_indices = @transform_2, window_bounds = array<i64: 1, 24>}, {pipeline_mode = #tpu.pipeline_mode<synchronous>, transform_indices = @transform_3, window_bounds = array<i64: 12, 24>}, {pipeline_mode = #tpu.pipeline_mode<synchronous>, transform_indices = @transform_4, window_bounds = array<i64: 12, 1>}, {pipeline_mode = #tpu.pipeline_mode<synchronous>, transform_indices = @transform_5, window_bounds = array<i64: 6, 12>}, {pipeline_mode = #tpu.pipeline_mode<synchronous>, transform_indices = @transform_6, window_bounds = array<i64: 6, 1>}, {pipeline_mode = #tpu.pipeline_mode<synchronous>, transform_indices = @transform_7, window_bounds = array<i64: 1, 6>}, {pipeline_mode = #tpu.pipeline_mode<synchronous>, transform_indices = @transform_8, window_bounds = array<i64: 1, 1>}, {transform_indices = @transform_9, window_bounds = array<i64: 1, 128>}]} {
    %c0 = arith.constant 0 : index
    %c0_0 = arith.constant 0 : index
    %0 = vector.load %arg1[%c0, %c0_0] : memref<128x32xf32, #tpu.memory_space<vmem>>, vector<128x32xf32>
    %c0_1 = arith.constant 0 : index
    %c0_2 = arith.constant 0 : index
    %1 = vector.load %arg2[%c0_1, %c0_2] : memref<32x24xf32, #tpu.memory_space<vmem>>, vector<32x24xf32>
    %cst = arith.constant dense<0.000000e+00> : vector<128x24xf32>
    %2 = tpu.matmul %0, %1, %cst {dimension_numbers = #tpu.dot_dimension_numbers<[1], [0], [0], [1], [0, 0, 1, 1], [], []>} : vector<128x32xf32>, vector<32x24xf32>, vector<128x24xf32> -> vector<128x24xf32>
    %c0_3 = arith.constant 0 : index
    %c0_4 = arith.constant 0 : index
    %3 = vector.load %arg3[%c0_3, %c0_4] : memref<1x24xf32, #tpu.memory_space<vmem>>, vector<1x24xf32>
    %4 = vector.broadcast %3 : vector<1x24xf32> to vector<128x24xf32>
    %5 = arith.addf %2, %4 : vector<128x24xf32>
    %cst_5 = arith.constant 0.000000e+00 : f32
    %6 = vector.broadcast %cst_5 : f32 to vector<128x24xf32>
    %7 = arith.maximumf %5, %6 : vector<128x24xf32>
    %8 = tpu.transpose %7, [1, 0] : vector<128x24xf32> -> vector<24x128xf32>
    %c0_6 = arith.constant 0 : index
    %c0_7 = arith.constant 0 : index
    %9 = vector.load %arg4[%c0_6, %c0_7] : memref<12x24xf32, #tpu.memory_space<vmem>>, vector<12x24xf32>
    %cst_8 = arith.constant dense<0.000000e+00> : vector<12x128xf32>
    %10 = tpu.matmul %9, %8, %cst_8 {dimension_numbers = #tpu.dot_dimension_numbers<[1], [0], [0], [1], [0, 0, 1, 1], [], []>} : vector<12x24xf32>, vector<24x128xf32>, vector<12x128xf32> -> vector<12x128xf32>
    %c0_9 = arith.constant 0 : index
    %c0_10 = arith.constant 0 : index
    %11 = vector.load %arg5[%c0_9, %c0_10] : memref<12x1xf32, #tpu.memory_space<vmem>>, vector<12x1xf32>
    %12 = vector.broadcast %11 : vector<12x1xf32> to vector<12x128xf32>
    %13 = arith.addf %10, %12 : vector<12x128xf32>
    %cst_11 = arith.constant 0.000000e+00 : f32
    %14 = vector.broadcast %cst_11 : f32 to vector<12x128xf32>
    %15 = arith.maximumf %13, %14 : vector<12x128xf32>
    %c0_12 = arith.constant 0 : index
    %c0_13 = arith.constant 0 : index
    %16 = vector.load %arg6[%c0_12, %c0_13] : memref<6x12xf32, #tpu.memory_space<vmem>>, vector<6x12xf32>
    %cst_14 = arith.constant dense<0.000000e+00> : vector<6x128xf32>
    %17 = tpu.matmul %16, %15, %cst_14 {dimension_numbers = #tpu.dot_dimension_numbers<[1], [0], [0], [1], [0, 0, 1, 1], [], []>} : vector<6x12xf32>, vector<12x128xf32>, vector<6x128xf32> -> vector<6x128xf32>
    %c0_15 = arith.constant 0 : index
    %c0_16 = arith.constant 0 : index
    %18 = vector.load %arg7[%c0_15, %c0_16] : memref<6x1xf32, #tpu.memory_space<vmem>>, vector<6x1xf32>
    %19 = vector.broadcast %18 : vector<6x1xf32> to vector<6x128xf32>
    %20 = arith.addf %17, %19 : vector<6x128xf32>
    %cst_17 = arith.constant 0.000000e+00 : f32
    %21 = vector.broadcast %cst_17 : f32 to vector<6x128xf32>
    %22 = arith.maximumf %20, %21 : vector<6x128xf32>
    %c0_18 = arith.constant 0 : index
    %c0_19 = arith.constant 0 : index
    %23 = vector.load %arg8[%c0_18, %c0_19] : memref<1x6xf32, #tpu.memory_space<vmem>>, vector<1x6xf32>
    %cst_20 = arith.constant dense<0.000000e+00> : vector<1x128xf32>
    %24 = tpu.matmul %23, %22, %cst_20 {dimension_numbers = #tpu.dot_dimension_numbers<[1], [0], [0], [1], [0, 0, 1, 1], [], []>} : vector<1x6xf32>, vector<6x128xf32>, vector<1x128xf32> -> vector<1x128xf32>
    %c0_21 = arith.constant 0 : index
    %c0_22 = arith.constant 0 : index
    %25 = vector.load %arg9[%c0_21, %c0_22] : memref<1x1xf32, #tpu.memory_space<vmem>>, vector<1x1xf32>
    %26 = vector.broadcast %25 : vector<1x1xf32> to vector<1x128xf32>
    %27 = arith.addf %24, %26 : vector<1x128xf32>
    %c0_23 = arith.constant 0 : index
    %c0_24 = arith.constant 0 : index
    %28 = vector.load %arg10[%c0_23, %c0_24] : memref<1x128xf32, #tpu.memory_space<vmem>>, vector<1x128xf32>
    tpu.vector_store %arg10[%c0_23, %c0_24], %27 {strides = array<i32>} : memref<1x128xf32, #tpu.memory_space<vmem>>, vector<1x128xf32>,
    return
  }
  func.func @transform_0(%arg0: i32) -> (i32, i32) {
    %c0_i32 = arith.constant 0 : i32
    %c0_i32_0 = arith.constant 0 : i32
    return %arg0, %c0_i32 : i32, i32
  }
  func.func @transform_1(%arg0: i32) -> (i32, i32) {
    %c0_i32 = arith.constant 0 : i32
    %c0_i32_0 = arith.constant 0 : i32
    %c0_i32_1 = arith.constant 0 : i32
    return %c0_i32, %c0_i32_0 : i32, i32
  }
  func.func @transform_2(%arg0: i32) -> (i32, i32) {
    %c0_i32 = arith.constant 0 : i32
    %c0_i32_0 = arith.constant 0 : i32
    %c0_i32_1 = arith.constant 0 : i32
    return %c0_i32, %c0_i32_0 : i32, i32
  }
  func.func @transform_3(%arg0: i32) -> (i32, i32) {
    %c0_i32 = arith.constant 0 : i32
    %c0_i32_0 = arith.constant 0 : i32
    %c0_i32_1 = arith.constant 0 : i32
    return %c0_i32, %c0_i32_0 : i32, i32
  }
  func.func @transform_4(%arg0: i32) -> (i32, i32) {
    %c0_i32 = arith.constant 0 : i32
    %c0_i32_0 = arith.constant 0 : i32
    %c0_i32_1 = arith.constant 0 : i32
    return %c0_i32, %c0_i32_0 : i32, i32
  }
  func.func @transform_5(%arg0: i32) -> (i32, i32) {
    %c0_i32 = arith.constant 0 : i32
    %c0_i32_0 = arith.constant 0 : i32
    %c0_i32_1 = arith.constant 0 : i32
    return %c0_i32, %c0_i32_0 : i32, i32
  }
  func.func @transform_6(%arg0: i32) -> (i32, i32) {
    %c0_i32 = arith.constant 0 : i32
    %c0_i32_0 = arith.constant 0 : i32
    %c0_i32_1 = arith.constant 0 : i32
    return %c0_i32, %c0_i32_0 : i32, i32
  }
  func.func @transform_7(%arg0: i32) -> (i32, i32) {
    %c0_i32 = arith.constant 0 : i32
    %c0_i32_0 = arith.constant 0 : i32
    %c0_i32_1 = arith.constant 0 : i32
    return %c0_i32, %c0_i32_0 : i32, i32
  }
  func.func @transform_8(%arg0: i32) -> (i32, i32) {
    %c0_i32 = arith.constant 0 : i32
    %c0_i32_0 = arith.constant 0 : i32
    %c0_i32_1 = arith.constant 0 : i32
    return %c0_i32, %c0_i32_0 : i32, i32
  }
  func.func @transform_9(%arg0: i32) -> (i32, i32) {
    %c0_i32 = arith.constant 0 : i32
    %c0_i32_0 = arith.constant 0 : i32
    return %c0_i32, %arg0 : i32, i32
  }
}

</mosaic_0001>

<bundles_post_ra>
// kernel: tpu_custom_call.1
= control target key start
LH: loop header
LB: loop body
LE: loop exit
PB: predicated region body
PF: predicated region fallthrough
CT: control target
= control target key end

     0   :  { %s1074_s0 = inlined_call_operand.vmem [shape: f32[8,32], index: 0, kind: input, shape index: {}]   ;;  %s1075_s1 = inlined_call_operand.vmem [shape: f32[32,24], index: 1, kind: input, shape index: {}]   ;;  %s1076_s2 = inlined_call_operand.vmem [shape: f32[1,24], index: 2, kind: input, shape index: {}]   ;;  %s1077_s3 = inlined_call_operand.vmem [shape: f32[12,24], index: 3, kind: input, shape index: {}]   ;;  %s1078_s4 = inlined_call_operand.vmem [shape: f32[12,1], index: 4, kind: input, shape index: {}]   ;;  %s1079_s5 = inlined_call_operand.vmem [shape: f32[6,12], index: 5, kind: input, shape index: {}]   ;;  %s1080_s6 = inlined_call_operand.vmem [shape: f32[6,1], index: 6, kind: input, shape index: {}]   ;;  %s1081_s7 = inlined_call_operand.vmem [shape: f32[1,6], index: 7, kind: input, shape index: {}]   ;;  %s1082_s8 = inlined_call_operand.<no memory space> [shape: f32[1,1], index: 8, kind: input, shape index: {}]   ;;  %s1083_s9 = inlined_call_operand.hbm [shape: f32[1,128], index: 9, kind: output, shape index: {}]  }
   0x1   :  { %v14_v0 = vstv %s1082_s8 }
   0x2   :  { %15 = vst [vmem:[#allocation2] sm:$0x1] %v14_v0 }
   0x3   :  { %v51_v1 = vld [vmem:[%s1075_s1] sm:$0xff]  ;;  %v52_v2 = vld [vmem:[%s1075_s1 + $0x8] sm:$0xff]  ;;  %v53_v3 = vld [vmem:[%s1075_s1 + $0x10] sm:$0xff]  ;;  %vm62_vm0 = vcmask 261120  }
   0x4   :  { %v769_v4 = vpack.c.bf16 %v52_v2, %v51_v1  ;;  %v54_v5 = vld [vmem:[%s1075_s1 + $0x18] sm:$0xff]  ;;  %v35_v6 = vld [vmem:[%s1074_s0] sm:$0xff] }
   0x5   :  { %v773_v7 = vpack.c.bf16 %v54_v5, %v53_v3  ;;  %698 = vmatprep.mubr.msk.f32.mxu0 %vm62_vm0, %v35_v6 }
   0x6   :  { %770 = vmatprep.subr.bf16.mxu0 %v769_v4 }
   0x7   :  { %772 = vmatpush3.bf16.msra.mxu0 %v769_v4 }
   0x8   :  { %774 = vmatprep.subr.bf16.mxu0 %v773_v7 }
   0x9   :  { %16 = vsyncpa [#allocation4], 0  ;;  %v36_v8 = vld [vmem:[%s1074_s0 + $0x8] sm:$0xff]  ;;  %v37_v9 = vld [vmem:[%s1074_s0 + $0x10] sm:$0xff]  ;;  %vm286_vm1 = vcmask 195584   ;;  %v861_v25 = vmov 0  }
   0xa   :  { %v38_v10 = vld [vmem:[%s1074_s0 + $0x18] sm:$0xff]  ;;  %v39_v11 = vld [vmem:[%s1074_s0 + $0x20] sm:$0xff]  ;;  %v40_v12 = vld [vmem:[%s1074_s0 + $0x28] sm:$0xff]  ;;  %835 = vset.pattern.permute.xlu0 %v861_v25  ;;  %836 = vset.pattern.permute.xlu1 %v861_v25  ;;  %vm863_vm3 = vmmov 0   ;;  %vm429_vm4 = vcmask 1043456   ;;  %vm865_vm5 = vmmov 1  }
   0xb   :  { %776 = vmatpush3.bf16.msra.mxu0 %v773_v7  ;;  %v41_v13 = vld [vmem:[%s1074_s0 + $0x30] sm:$0xff]  ;;  %v42_v14 = vld [vmem:[%s1074_s0 + $0x38] sm:$0xff]  ;;  %v43_v15 = vld [vmem:[%s1074_s0 + $0x40] sm:$0xff]  ;;  %vm425_vm7 = vcmask 97280   ;;  %vm519_vm8 = vcmask 1045504   ;;  %vm515_vm9 = vcmask 48128  }
   0xc   :  { %v44_v16 = vld [vmem:[%s1074_s0 + $0x48] sm:$0xff]  ;;  %v45_v17 = vld [vmem:[%s1074_s0 + $0x50] sm:$0xff]  ;;  %v46_v18 = vld [vmem:[%s1074_s0 + $0x58] sm:$0xff] }
   0xd   :  { %v47_v19 = vld [vmem:[%s1074_s0 + $0x60] sm:$0xff]  ;;  %v48_v20 = vld [vmem:[%s1074_s0 + $0x68] sm:$0xff]  ;;  %v49_v21 = vld [vmem:[%s1074_s0 + $0x70] sm:$0xff] }
   0xe   :  { %699 = vmatmul.mubr.msk.f32.vlgmr.msra.gmra.mrb[0].mxu0 %vm62_vm0, %v36_v8  ;;  %v50_v22 = vld [vmem:[%s1074_s0 + $0x78] sm:$0xff]  ;;  %v272_v23 = vld [vmem:[%s1077_s3] sm:$0xff]  ;;  %v275_v26 = vld [vmem:[%s1078_s4 + $0x8] sm:$0xf] }
   0xf   :  { %701 = vmatprep.mubr.msk.f32.mxu0 %vm62_vm0, %v37_v9  ;;  %754 = vmatprep.mubr.msk.f32.mxu1 %vm286_vm1, %v272_v23  ;;  %v274_v24 = vld [vmem:[%s1078_s4] sm:$0xff]  ;;  %vm1011_vm2 = vmpackc.low %vm286_vm1, %vm286_vm1  ;;  %v864_v23 = vmov 0.0  }
  0x10   :  { %278 = vperm.xlu0 %835, %v274_v24   ;;  %v608_v27 = vld [vmem:[%s1076_s2] ss:$0 sm:$0xff]  ;;  %vm827_vm6 = vmpackc.low %vm429_vm4, %vm865_vm5 }
  0x11   :  { %v419_v24 = vld [vmem:[%s1080_s6] sm:$0x3f] }
  0x12   :  { %702 = vmatmul.mubr.msk.f32.gmra.mrb[2].mxu0 %vm62_vm0, %v38_v10  ;;  %422 = vperm.xlu1 %836, %v419_v24   ;;  %v505_v25 = vld [vmem:[#allocation2] sm:$0x1] }
  0x13   :  { %704 = vmatprep.mubr.msk.f32.mxu0 %vm62_vm0, %v39_v11 }
  0x14   :  { %283 = vperm.xlu0 %835, %v275_v26  }
  0x16   :  { %705 = vmatmul.mubr.msk.f32.gmra.mrb[4].mxu0 %vm62_vm0, %v40_v12  ;;  %508 = vperm.xlu1 %836, %v505_v25  }
  0x17   :  { %707 = vmatprep.mubr.msk.f32.mxu0 %vm62_vm0, %v41_v13 }
  0x1a   :  { %708 = vmatmul.mubr.msk.f32.gmra.mrb[6].mxu0 %vm62_vm0, %v42_v14 }
  0x1b   :  { %710 = vmatprep.mubr.msk.f32.mxu0 %vm62_vm0, %v43_v15 }
  0x1e   :  { %711 = vmatmul.mubr.msk.f32.gmra.mrb[8].mxu0 %vm62_vm0, %v44_v16 }
  0x1f   :  { %713 = vmatprep.mubr.msk.f32.mxu0 %vm62_vm0, %v45_v17 }
  0x22   :  { %714 = vmatmul.mubr.msk.f32.gmra.mrb[10].mxu0 %vm62_vm0, %v46_v18 }
  0x23   :  { %716 = vmatprep.mubr.msk.f32.mxu0 %vm62_vm0, %v47_v19 }
  0x26   :  { %717 = vmatmul.mubr.msk.f32.gmra.mrb[12].mxu0 %vm62_vm0, %v48_v20 }
  0x27   :  { %719 = vmatprep.mubr.msk.f32.mxu0 %vm62_vm0, %v49_v21  ;;  %v273_v21 = vld [vmem:[%s1077_s3 + $0x8] sm:$0xf] }
  0x2a   :  { %720 = vmatmul.mubr.msk.f32.gmra.mrb[14].mxu0 %vm62_vm0, %v50_v22  ;;  %v862_v22 = vmov 0.0|0.0  }
  0x2b   :  { %825 = vmatprep.subr.bf16.mxu0 %v862_v22  ;;  %761 = vmatprep.mubr.msk.f32.mxu0 %vm863_vm3, %v864_v23 }
  0x8f   :  { %v279_v26 = vpop.permute.xlu0 %278 }
  0xe1   :  { %v700_v28 = vpop.f32.mrb[0].mxu0 }
  0xe2   :  { %v183_v29 = vadd.f32 %v700_v28, %v608_v27  ;;  %v177_v30 = vpop.f32.mrb[1].mxu0 }
  0xe3   :  { %v178_v31 = vadd.f32 %v608_v27, %v177_v30 }
  0xe4   :  { %v257_v32 = vmax.f32 %v183_v29, 0.0 }
  0xe5   :  { %v256_v33 = vmax.f32 %v178_v31, 0.0  ;;  %v703_v34 = vpop.f32.mrb[2].mxu0 }
  0xe6   :  { %v193_v35 = vadd.f32 %v703_v34, %v608_v27  ;;  %v187_v36 = vpop.f32.mrb[3].mxu0 }
  0xe7   :  { %v188_v38 = vadd.f32 %v608_v27, %v187_v36  ;;  %v777_v39 = vpack.c.bf16 %v257_v32, %v256_v33  ;;  %v423_v36 = vpop.permute.xlu1 %422 }
  0xe8   :  { %v259_v40 = vmax.f32 %v193_v35, 0.0  ;;  %v418_v35 = vld [vmem:[%s1079_s5] sm:$0x3f]  ;;  %s866_s5 = smov [#allocation3]  }
  0xe9   :  { %v258_v41 = vmax.f32 %v188_v38, 0.0  ;;  %779 = vmatprep.subr.msk.bf16.mxu1 %vm1011_vm2, %v777_v39  ;;  %v706_v42 = vpop.f32.mrb[4].mxu0  ;;  %s600_s16 = sshll.u32 %s866_s5, 4  ;;  %s601_s16 = int_to_ptr.vmem [resolvable:$true] %s600_s16 }
  0xea   :  { %782 = vmatpush3.bf16.xpose.msk.msra.mxu1 %vm1011_vm2, %v777_v39  ;;  %v203_v43 = vadd.f32 %v706_v42, %v608_v27  ;;  %v197_v44 = vpop.f32.mrb[5].mxu0  ;;  %v511_v42 = vlaneseq  ;;  %s837_s17 = scalar_lea.vmem %s601_s16, 16  ;;  %s841_s18 = scalar_lea.vmem %s601_s16, 32 }
  0xeb   :  { %v783_v45 = vpack.c.bf16 %v259_v40, %v258_v41  ;;  %v198_v46 = vadd.f32 %v608_v27, %v197_v44  ;;  %v504_v41 = vld [vmem:[%s1081_s7] sm:$0x1]  ;;  %p838_p0 = scmp.ne.s32.totalorder %s601_s16, %s837_s17  ;;  %p842_p1 = scmp.lt.s32.totalorder %s601_s16, %s601_s16 }
  0xec   :  { %v261_v47 = vmax.f32 %v203_v43, 0.0  ;;  %v512_v43 = vshrl.u32 %v511_v42, 7  ;;  %p843_p2 = scmp.lt.s32.totalorder %s841_s18, %s837_s17 }
  0xed   :  { %785 = vmatprep.subr.msk.bf16.mxu1 %vm1011_vm2, %v783_v45  ;;  %v260_v48 = vmax.f32 %v198_v46, 0.0  ;;  %v709_v49 = vpop.f32.mrb[6].mxu0 }
  0xee   :  { %v213_v50 = vadd.f32 %v709_v49, %v608_v27  ;;  %v207_v51 = vpop.f32.mrb[7].mxu0  ;;  %v513_v44 = vsub.s32 0, %v512_v43  ;;  %p844_p3 = por %p843_p2, %p842_p1 }
  0xef   :  { %v789_v52 = vpack.c.bf16 %v261_v47, %v260_v48  ;;  %v208_v53 = vadd.f32 %v608_v27, %v207_v51 }
  0xf0   :  { %v263_v54 = vmax.f32 %v213_v50, 0.0  ;;  %p845_p4 = pnand %p844_p3, %p838_p0 }
  0xf1   :  { %v262_v55 = vmax.f32 %v208_v53, 0.0  ;;  %v712_v56 = vpop.f32.mrb[8].mxu0 }
  0xf2   :  { %788 = vmatpush3.bf16.xpose.msk.msra.mxu1 %vm1011_vm2, %v783_v45  ;;  %v223_v57 = vadd.f32 %v712_v56, %v608_v27  ;;  %v217_v58 = vpop.f32.mrb[9].mxu0  ;;  %v509_v45 = vpop.permute.xlu1 %508 }
  0xf3   :  { %791 = vmatprep.subr.msk.bf16.mxu1 %vm1011_vm2, %v789_v52  ;;  %v795_v59 = vpack.c.bf16 %v263_v54, %v262_v55  ;;  %v218_v60 = vadd.f32 %v608_v27, %v217_v58  ;;  %v514_v46 = vrot.slane %v509_v45, %v513_v44 }
  0xf4   :  { %v265_v61 = vmax.f32 %v223_v57, 0.0 }
  0xf5   :  { %v264_v62 = vmax.f32 %v218_v60, 0.0  ;;  %v715_v63 = vpop.f32.mrb[10].mxu0 }
  0xf6   :  { %v233_v0 = vadd.f32 %v715_v63, %v608_v27  ;;  %v227_v1 = vpop.f32.mrb[11].mxu0 }
  0xf7   :  { %v801_v2 = vpack.c.bf16 %v265_v61, %v264_v62  ;;  %v228_v3 = vadd.f32 %v608_v27, %v227_v1 }
  0xf8   :  { %v267_v4 = vmax.f32 %v233_v0, 0.0 }
  0xf9   :  { %v266_v5 = vmax.f32 %v228_v3, 0.0  ;;  %v718_v6 = vpop.f32.mrb[12].mxu0 }
  0xfa   :  { %794 = vmatpush3.bf16.xpose.msk.msra.mxu1 %vm1011_vm2, %v789_v52  ;;  %v243_v7 = vadd.f32 %v718_v6, %v608_v27  ;;  %v237_v8 = vpop.f32.mrb[13].mxu0 }
  0xfb   :  { %797 = vmatprep.subr.msk.bf16.mxu1 %vm1011_vm2, %v795_v59  ;;  %v807_v9 = vpack.c.bf16 %v267_v4, %v266_v5  ;;  %v238_v10 = vadd.f32 %v608_v27, %v237_v8 }
  0xfc   :  { %v269_v11 = vmax.f32 %v243_v7, 0.0 }
  0xfd   :  { %v268_v12 = vmax.f32 %v238_v10, 0.0  ;;  %v721_v13 = vpop.f32.mrb[14].mxu0 }
  0xfe   :  { %v253_v14 = vadd.f32 %v721_v13, %v608_v27  ;;  %v247_v15 = vpop.f32.mrb[15].mxu0 }
  0xff   :  { %v813_v16 = vpack.c.bf16 %v269_v11, %v268_v12  ;;  %v248_v17 = vadd.f32 %v608_v27, %v247_v15  ;;  %v284_v27 = vpop.permute.xlu0 %283 }
 0x100   :  { %v271_v18 = vmax.f32 %v253_v14, 0.0 }
 0x101   :  { %v270_v19 = vmax.f32 %v248_v17, 0.0 }
 0x102   :  { %800 = vmatpush3.bf16.xpose.msk.msra.mxu1 %vm1011_vm2, %v795_v59 }
 0x103   :  { %803 = vmatprep.subr.msk.bf16.mxu1 %vm1011_vm2, %v801_v2  ;;  %v819_v20 = vpack.c.bf16 %v271_v18, %v270_v19 }
 0x10a   :  { %806 = vmatpush3.bf16.xpose.msk.msra.mxu1 %vm1011_vm2, %v801_v2 }
 0x10b   :  { %809 = vmatprep.subr.msk.bf16.mxu1 %vm1011_vm2, %v807_v9 }
 0x112   :  { %812 = vmatpush3.bf16.xpose.msk.msra.mxu1 %vm1011_vm2, %v807_v9 }
 0x113   :  { %815 = vmatprep.subr.msk.bf16.mxu1 %vm1011_vm2, %v813_v16 }
 0x11a   :  { %818 = vmatpush3.bf16.xpose.msk.msra.mxu1 %vm1011_vm2, %v813_v16 }
 0x11b   :  { %821 = vmatprep.subr.msk.bf16.mxu1 %vm1011_vm2, %v819_v20 }
 0x122   :  { %824 = vmatpush3.bf16.xpose.msk.msra.mxu1 %vm1011_vm2, %v819_v20 }
 0x129   :  { %755 = vmatmul.mubr.msk.f32.vlgmr.msra.gmra.mrb[0].mxu1 %vm286_vm1, %v273_v21 }
 0x1fc   :  { %v756_v28 = vpop.f32.mrb[0].mxu1 }
 0x1fd   :  { %v413_v29 = vadd.f32 %v756_v28, %v284_v27  ;;  %v407_v30 = vpop.f32.mrb[1].mxu1 }
 0x1fe   :  { %v408_v31 = vadd.f32 %v407_v30, %v279_v26 }
 0x1ff   :  { %v417_v32 = vmax.f32 %v413_v29, 0.0 }
 0x200   :  { %v416_v33 = vmax.f32 %v408_v31, 0.0 }
 0x202   :  { %v826_v34 = vpack.c.bf16 %v417_v32, %v416_v33 }
 0x204   :  { %828 = vmatpush3.bf16.msk.msra.mxu0 %vm827_vm6, %v826_v34 }
 0x205   :  { %764 = vmatprep.subr.mxu0 %v864_v23 }
 0x207   :  { %762 = vmatmul.mubr.msk.f32.vlgmr.msra.gmra.mrb[16].mxu0 %vm425_vm7, %v418_v35 }
 0x208   :  { %766 = vmatprep.mubr.msk.f32.mxu0 %vm863_vm3, %v864_v23 }
 0x2da   :  { %v499_v37 = vpop.f32.mrb[16].mxu0 }
 0x2db   :  { %v500_v38 = vadd.f32 %v499_v37, %v423_v36  ;;  %v763_v39 = vpop.f32.mrb[17].mxu0 }
 0x2dd   :  { %v503_v40 = vmax.f32 %v500_v38, 0.0 }
 0x2df   :  { %765 = vmatpush3.msk.msra.mxu0 %vm519_vm8, %v503_v40 }
 0x2e0   :  { %767 = vmatmul.mubr.msk.f32.vlgmr.msra.gmra.mrb[18].mxu0 %vm515_vm9, %v504_v41 }
 0x3b3   :  { %v589_v47 = vpop.f32.mrb[18].mxu0 }
 0x3b4   :  { %v590_v48 = vadd.f32 %v589_v47, %v514_v46  ;;  %v768_v49 = vpop.f32.mrb[19].mxu0 }
 0x3b6   :  { %593 = vst [vmem:[#allocation3] sm:$0x1] %v590_v48 }
 0x3b7   :  { %848 = shalt.err (!%p845_p4)
}
 0x3b8   :  { %s849_s19 = scalar_lea.hbm %s1083_s9, 16 }
 0x3b9   :  { %p850_p5 = scmp.ne.s32.totalorder %s1083_s9, %s849_s19  ;;  %p853_p6 = scmp.lt.u32.totalorder %s849_s19, %s1083_s9 }
 0x3bb   :  { %p855_p7 = pnand %p853_p6, %p850_p5 }
 0x3bd   :  { %858 = shalt.err (!%p855_p7)
}
 0x3be   :  { %603 = dma.vmem_to_hbm [thread:$0]  %s601_s16, 16, %s1083_s9, [#allocation4]  }
 0x3bf   :  { %859 = dma.done.wait [#allocation4], 16  }
 0x3c0   :  { %860 = vsyncadd [#allocation4], 4294967280 }
 0x3c1   :  { %607 = vsyncpa [#allocation4], 1 }

</bundles_post_ra>
